<compile_context>
chip_gen: v7x
topology: tpu7x:2x2x1
jax: 0.10.0
libtpu: 0.0.40
codegen_flags: <defaults>
</compile_context>

<pallas_src>
import jax
import jax.numpy as jnp
from jax.experimental import pallas as pl
from jax.experimental.pallas import tpu as pltpu

EPS = 1e-10

# First-layer biases (weight is identity); later layers are folded into the
# XOR form in the kernel body.
B1_0, B1_1 = -0.5, 0.0


def mlp_kernel(x_ref, o_ref):
    # x_ref: (2, TS, 128) f32 — feature axis leading, batch dense on
    # (sublane, lane).  o_ref: (TS, 128) f32.
    x0 = x_ref[0]                                      # (TS, 128) position
    x1 = x_ref[1]                                      # (TS, 128) velocity

    # Step(Linear1(x)) — EPS placement matches the reference bit-for-bit.
    s0 = (x0 + B1_0) + EPS >= 0.0
    s1 = (x1 + B1_1) + EPS >= 0.0

    # Collapsed Linear2 + ReLU + Linear3 + Sign: +1 iff exactly one of s0, s1.
    o_ref[...] = jnp.where(s0 != s1, 1.0, -1.0).astype(o_ref.dtype)


def _round_up(a, b):
    return ((a + b - 1) // b) * b


@jax.jit
def mountain_car_mlp(x):
    """x: (B, 2) float32  ->  (B, 1) float32 (matches MountainCarMLP.forward)."""
    B = x.shape[0]
    xt = x.astype(jnp.float32).T                       # (2, B); fuses under jit
    B_pad = _round_up(B, 128)
    if B_pad != B:                                     # at most 127 pad columns
        xt = jnp.pad(xt, ((0, 0), (0, B_pad - B)))
    R = B_pad // 128
    x3 = xt.reshape(2, R, 128)                         # free reshape: batch dense

    TS_MAX = 2048                                      # ~3 MiB/step, ~6 MiB dbl-buffered
    if R <= 16:
        TS = R                                         # single full-extent block
    else:
        # >=2 grid steps so v7x can shard the batch axis across both TCs.
        TS = min(TS_MAX, _round_up(pl.cdiv(R, 2), 8))
    num_blocks = pl.cdiv(R, TS)

    out = pl.pallas_call(
        mlp_kernel,
        out_shape=jax.ShapeDtypeStruct((R, 128), jnp.float32),
        grid=(num_blocks,),
        in_specs=[pl.BlockSpec((2, TS, 128), lambda i: (0, i, 0))],
        out_specs=pl.BlockSpec((TS, 128), lambda i: (i, 0)),
        compiler_params=pltpu.CompilerParams(
            dimension_semantics=("parallel",)),
    )(x3)

    return out.reshape(B_pad)[:B].reshape(B, 1)        # slice/reshape fuse under jit


def reference(x):
    # Pure-JAX reference mirroring the PyTorch module exactly (explicit matmuls).
    w1 = jnp.array([[1.0, 0.0], [0.0, 1.0]], dtype=jnp.float32)   # (in, out)
    b1 = jnp.array([-0.5, 0.0], dtype=jnp.float32)
    w2 = jnp.ones((2, 2), dtype=jnp.float32)
    b2 = jnp.array([0.0, -1.0], dtype=jnp.float32)
    w3 = jnp.array([[1.0], [-2.0]], dtype=jnp.float32)
    b3 = jnp.array([-0.5], dtype=jnp.float32)

    h = jnp.dot(x, w1, precision="highest") + b1
    h = (h + EPS >= 0.0).astype(jnp.float32)
    h = jnp.dot(h, w2, precision="highest") + b2
    h = jnp.maximum(h, 0.0)
    h = jnp.dot(h, w3, precision="highest") + b3
    return jnp.sign(h + EPS)


if __name__ == "__main__":
    key = jax.random.PRNGKey(0)
    B = 1000  # small; not a multiple of 128, so the pad/slice edge path is exercised
    # MountainCar observations: (position, velocity) pairs — shape (B, 2)
    x = jax.random.normal(key, (B, 2), dtype=jnp.float32)

    out = jax.block_until_ready(mountain_car_mlp(x))
    ref = reference(x)

    assert out.shape == (B, 1), out.shape
    assert bool(jnp.allclose(out, ref)), "kernel output does not match reference"

    print("KERNEL_OK")
</pallas_src>

<mosaic_0001>
module attributes {stable_mosaic.version = 11 : i64} {
  func.func @mlp_kernel(%arg0: i32, %arg1: memref<2x8x128xf32, #tpu.memory_space<vmem>>, %arg2: memref<8x128xf32, #tpu.memory_space<vmem>>) attributes {dimension_semantics = [#tpu.dimension_semantics<parallel>], iteration_bounds = array<i64: 1>, scalar_prefetch = 0 : i64, scratch_operands = 0 : i64, tpu.core_type = #tpu.core_type<tc>, window_params = [{transform_indices = @transform_0, window_bounds = array<i64: 2, 8, 128>}, {transform_indices = @transform_1, window_bounds = array<i64: 8, 128>}]} {
    %c0 = arith.constant 0 : index
    %c0_0 = arith.constant 0 : index
    %c0_1 = arith.constant 0 : index
    %0 = vector.load %arg1[%c0, %c0_0, %c0_1] : memref<2x8x128xf32, #tpu.memory_space<vmem>>, vector<1x8x128xf32>
    %1 = vector.shape_cast %0 : vector<1x8x128xf32> to vector<8x128xf32>
    %c1 = arith.constant 1 : index
    %c0_2 = arith.constant 0 : index
    %c0_3 = arith.constant 0 : index
    %2 = vector.load %arg1[%c1, %c0_2, %c0_3] : memref<2x8x128xf32, #tpu.memory_space<vmem>>, vector<1x8x128xf32>
    %3 = vector.shape_cast %2 : vector<1x8x128xf32> to vector<8x128xf32>
    %cst = arith.constant -5.000000e-01 : f32
    %4 = vector.broadcast %cst : f32 to vector<8x128xf32>
    %5 = arith.addf %1, %4 : vector<8x128xf32>
    %cst_4 = arith.constant 1.000000e-10 : f32
    %6 = vector.broadcast %cst_4 : f32 to vector<8x128xf32>
    %7 = arith.addf %5, %6 : vector<8x128xf32>
    %cst_5 = arith.constant 0.000000e+00 : f32
    %8 = vector.broadcast %cst_5 : f32 to vector<8x128xf32>
    %9 = arith.cmpf oge, %7, %8 : vector<8x128xf32>
    %cst_6 = arith.constant 0.000000e+00 : f32
    %10 = vector.broadcast %cst_6 : f32 to vector<8x128xf32>
    %11 = arith.addf %3, %10 : vector<8x128xf32>
    %cst_7 = arith.constant 1.000000e-10 : f32
    %12 = vector.broadcast %cst_7 : f32 to vector<8x128xf32>
    %13 = arith.addf %11, %12 : vector<8x128xf32>
    %cst_8 = arith.constant 0.000000e+00 : f32
    %14 = vector.broadcast %cst_8 : f32 to vector<8x128xf32>
    %15 = arith.cmpf oge, %13, %14 : vector<8x128xf32>
    %16 = arith.xori %9, %15 : vector<8x128xi1>
    %cst_9 = arith.constant 1.000000e+00 : f32
    %cst_10 = arith.constant -1.000000e+00 : f32
    %17 = vector.broadcast %cst_9 : f32 to vector<8x128xf32>
    %18 = vector.broadcast %cst_10 : f32 to vector<8x128xf32>
    %19 = arith.select %16, %17, %18 : vector<8x128xi1>, vector<8x128xf32>
    %c0_11 = arith.constant 0 : index
    %c0_12 = arith.constant 0 : index
    %20 = vector.load %arg2[%c0_11, %c0_12] : memref<8x128xf32, #tpu.memory_space<vmem>>, vector<8x128xf32>
    tpu.vector_store %arg2[%c0_11, %c0_12], %19 {strides = array<i32>} : memref<8x128xf32, #tpu.memory_space<vmem>>, vector<8x128xf32>,
    return
  }
  func.func @transform_0(%arg0: i32) -> (i32, i32, i32) {
    %c0_i32 = arith.constant 0 : i32
    %c0_i32_0 = arith.constant 0 : i32
    %c0_i32_1 = arith.constant 0 : i32
    return %c0_i32, %arg0, %c0_i32_0 : i32, i32, i32
  }
  func.func @transform_1(%arg0: i32) -> (i32, i32) {
    %c0_i32 = arith.constant 0 : i32
    %c0_i32_0 = arith.constant 0 : i32
    return %arg0, %c0_i32 : i32, i32
  }
}

</mosaic_0001>

<bundles_post_ra>
// kernel: mountain_car_mlp.1
= control target key start
LH: loop header
LB: loop body
LE: loop exit
PB: predicated region body
PF: predicated region fallthrough
CT: control target
= control target key end

     0   :  { %s92_s0 = inlined_call_operand.vmem [shape: f32[2,8,128], index: 0, kind: input, shape index: {}]   ;;  %s93_s1 = inlined_call_operand.hbm [shape: f32[8,128], index: 1, kind: output, shape index: {}]  }
   0x1   :  { %v9_v0 = vld [vmem:[%s92_s0] sm:$0xff]  ;;  %v35_v1 = vld [vmem:[%s92_s0 + $0x8] sm:$0xff] }
   0x2   :  { %6 = vsyncpa [#allocation3], 0  ;;  %v12_v2 = vadd.f32 -0.5, %v9_v0  ;;  %v16_v3 = vadd.f32 1e-10, %v35_v1  ;;  %s62_s10 = smov [#allocation2]  }
   0x3   :  { %s27_s11 = sshll.u32 %s62_s10, 4  ;;  %v63_v5 = vmov -1.0   ;;  %s28_s11 = int_to_ptr.vmem [resolvable:$true] %s27_s11 }
   0x4   :  { %v13_v4 = vadd.f32 1e-10, %v12_v2  ;;  %vm17_vm0 = vcmp.ge.f32.partialorder %v16_v3, 0.0  ;;  %s38_s12 = scalar_lea.vmem %s28_s11, 128  ;;  %p43_p1 = scmp.lt.s32.totalorder %s28_s11, %s28_s11 }
   0x5   :  { %p39_p0 = scmp.ne.s32.totalorder %s28_s11, %s38_s12  ;;  %p44_p2 = scmp.lt.s32.totalorder %s38_s12, %s38_s12 }
   0x6   :  { %vm14_vm1 = vcmp.ge.f32.partialorder %v13_v4, 0.0 }
   0x7   :  { %vm18_vm2 = vmxor %vm14_vm1, %vm17_vm0  ;;  %p45_p3 = por %p44_p2, %p43_p1 }
   0x8   :  { %v19_v6 = vsel %vm18_vm2, 1.0, %v63_v5 }
   0x9   :  { %20 = vst [vmem:[#allocation2] sm:$0xff] %v19_v6  ;;  %p46_p4 = pnand %p45_p3, %p39_p0 }
   0xb   :  { %49 = shalt.err (!%p46_p4)
}
   0xc   :  { %s50_s14 = scalar_lea.hbm %s93_s1, 128 }
   0xd   :  { %p51_p5 = scmp.ne.s32.totalorder %s93_s1, %s50_s14  ;;  %p54_p6 = scmp.lt.u32.totalorder %s50_s14, %s93_s1 }
   0xf   :  { %p56_p7 = pnand %p54_p6, %p51_p5 }
  0x11   :  { %59 = shalt.err (!%p56_p7)
}
  0x12   :  { %30 = dma.vmem_to_hbm [thread:$0]  %s28_s11, 128, %s93_s1, [#allocation3]  }
  0x13   :  { %60 = dma.done.wait [#allocation3], 128  }
  0x14   :  { %61 = vsyncadd [#allocation3], 4294967168 }
  0x15   :  { %34 = vsyncpa [#allocation3], 1 }

</bundles_post_ra>
